<compile_context>
chip_gen: v7x
topology: tpu7x:2x2x1
jax: 0.10.0
libtpu: 0.0.40
codegen_flags: <defaults>
</compile_context>

<pallas_src>
import functools

import jax
import jax.numpy as jnp
from jax.experimental import pallas as pl
from jax.experimental.pallas import tpu as pltpu


def _permute_kernel(x_ref, o_ref, *, perm):
    # x_ref block, transposed by `perm`, is exactly the corresponding o_ref
    # block.  For permutations that keep the minor dims in place this is a
    # pure copy; for minor-dim swaps it lowers to an XLU transpose in VMEM.
    o_ref[...] = jnp.transpose(x_ref[...], perm)


def _pick_tile(dim, multiple, cap):
    """Largest tile <= cap that is a multiple of `multiple` and divides `dim`.

    Falls back to the full extent (always legal for the last two block dims).
    """
    if dim % multiple != 0:
        return dim
    t = min(dim, cap)
    t = (t // multiple) * multiple
    while t > multiple and dim % t != 0:
        t -= multiple
    if t <= 0 or dim % t != 0:
        return dim
    return t


def permute_forward(x, perm, *, tile_cap=512):
    """Pallas implementation of torch.Tensor.permute(perm)."""
    perm = tuple(int(p) for p in perm)
    ndim = x.ndim
    assert sorted(perm) == list(range(ndim)), f"bad permutation {perm} for rank {ndim}"

    if ndim < 2:
        # permute of a 0-D / 1-D tensor is the identity.
        return x

    out_shape = tuple(x.shape[p] for p in perm)
    inv = [0] * ndim                       # inv[input_axis] = output_axis
    for o, a in enumerate(perm):
        inv[a] = o

    # Choose a block size per OUTPUT axis.
    #  - axes that are leading on both input and output: block 1 (grid axis).
    #  - axes that touch the last two dims of either side: full extent, or an
    #    (8,128)-legal tile capped at `tile_cap` to bound per-step VMEM.
    block_out = []
    for o in range(ndim):
        a = perm[o]
        out_minor, out_second = (o == ndim - 1), (o == ndim - 2)
        in_minor, in_second = (a == ndim - 1), (a == ndim - 2)
        dim = out_shape[o]
        if not (out_minor or out_second or in_minor or in_second):
            block_out.append(1)
        else:
            mult = 128 if (out_minor or in_minor) else 8
            block_out.append(_pick_tile(dim, mult, tile_cap))
    block_out = tuple(block_out)
    block_in = tuple(block_out[inv[a]] for a in range(ndim))
    grid = tuple(out_shape[o] // block_out[o] for o in range(ndim))

    def out_index_map(*idx):
        return idx

    def in_index_map(*idx):
        return tuple(idx[inv[a]] for a in range(ndim))

    kernel = functools.partial(_permute_kernel, perm=perm)
    bytes_accessed = 2 * x.size * jnp.dtype(x.dtype).itemsize

    return pl.pallas_call(
        kernel,
        out_shape=jax.ShapeDtypeStruct(out_shape, x.dtype),
        grid_spec=pltpu.PrefetchScalarGridSpec(
            num_scalar_prefetch=0,
            grid=grid,
            in_specs=[pl.BlockSpec(block_in, in_index_map)],
            out_specs=pl.BlockSpec(block_out, out_index_map),
        ),
        compiler_params=pltpu.CompilerParams(
            dimension_semantics=("parallel",) * ndim),
        cost_estimate=pl.CostEstimate(
            flops=0, transcendentals=0, bytes_accessed=bytes_accessed),
    )(x)


class Permute:
    """Mirror of the torch nn.Module: Permute(*args)(x) == x.permute(*args)."""

    def __init__(self, *args):
        self.args = tuple(args)

    def __call__(self, x):
        return permute_forward(x, self.args)


if __name__ == "__main__":
    key = jax.random.PRNGKey(0)
    k1, k2, k3 = jax.random.split(key, 3)

    # Case 1: canonical usage -- (B, T, C) -> (B, C, T), e.g. around Conv1d.
    x1 = jax.random.normal(k1, (2, 16, 128), dtype=jnp.float32)
    out1 = jax.block_until_ready(Permute(0, 2, 1)(x1))
    ref1 = jnp.transpose(x1, (0, 2, 1))
    assert out1.shape == ref1.shape, (out1.shape, ref1.shape)
    assert jnp.array_equal(out1, ref1)

    # Case 2: leading-dim permutation only -> pure BlockSpec remap, no in-kernel shuffle.
    x2 = jax.random.normal(k2, (2, 4, 16, 16), dtype=jnp.float32)
    out2 = jax.block_until_ready(Permute(1, 0, 2, 3)(x2))
    ref2 = jnp.transpose(x2, (1, 0, 2, 3))
    assert out2.shape == ref2.shape, (out2.shape, ref2.shape)
    assert jnp.array_equal(out2, ref2)

    # Case 3: trailing sublane/lane swap on a 4-D tensor.
    x3 = jax.random.normal(k3, (2, 4, 16, 128), dtype=jnp.float32)
    out3 = jax.block_until_ready(Permute(0, 1, 3, 2)(x3))
    ref3 = jnp.transpose(x3, (0, 1, 3, 2))
    assert out3.shape == ref3.shape, (out3.shape, ref3.shape)
    assert jnp.array_equal(out3, ref3)

    print("KERNEL_OK")
</pallas_src>

<mosaic_0001>
module attributes {stable_mosaic.version = 11 : i64} {
  func.func @_permute_kernel(%arg0: i32, %arg1: i32, %arg2: i32, %arg3: memref<1x16x128xf32, #tpu.memory_space<vmem>>, %arg4: memref<1x128x16xf32, #tpu.memory_space<vmem>>) attributes {dimension_semantics = [#tpu.dimension_semantics<parallel>, #tpu.dimension_semantics<parallel>, #tpu.dimension_semantics<parallel>], iteration_bounds = array<i64: 2, 1, 1>, scalar_prefetch = 0 : i64, scratch_operands = 0 : i64, tpu.core_type = #tpu.core_type<tc>, window_params = [{transform_indices = @transform_0, window_bounds = array<i64: 1, 16, 128>}, {transform_indices = @transform_1, window_bounds = array<i64: 1, 128, 16>}]} {
    %c0 = arith.constant 0 : index
    %c0_0 = arith.constant 0 : index
    %c0_1 = arith.constant 0 : index
    %0 = vector.load %arg3[%c0, %c0_0, %c0_1] : memref<1x16x128xf32, #tpu.memory_space<vmem>>, vector<1x16x128xf32>
    %1 = tpu.transpose %0, [0, 2, 1] : vector<1x16x128xf32> -> vector<1x128x16xf32>
    %c0_2 = arith.constant 0 : index
    %c0_3 = arith.constant 0 : index
    %c0_4 = arith.constant 0 : index
    %2 = vector.load %arg4[%c0_2, %c0_3, %c0_4] : memref<1x128x16xf32, #tpu.memory_space<vmem>>, vector<1x128x16xf32>
    tpu.vector_store %arg4[%c0_2, %c0_3, %c0_4], %1 {strides = array<i32>} : memref<1x128x16xf32, #tpu.memory_space<vmem>>, vector<1x128x16xf32>,
    return
  }
  func.func @transform_0(%arg0: i32, %arg1: i32, %arg2: i32) -> (i32, i32, i32) {
    %c0_i32 = arith.constant 0 : i32
    return %arg0, %arg2, %arg1 : i32, i32, i32
  }
  func.func @transform_1(%arg0: i32, %arg1: i32, %arg2: i32) -> (i32, i32, i32) {
    %c0_i32 = arith.constant 0 : i32
    return %arg0, %arg1, %arg2 : i32, i32, i32
  }
}

</mosaic_0001>

<bundles_post_ra>
// kernel: tpu_custom_call.1
= control target key start
LH: loop header
LB: loop body
LE: loop exit
PB: predicated region body
PF: predicated region fallthrough
CT: control target
= control target key end

     0   :  { %6 = vsyncpa [#allocation3], 0  ;;  %s669_s0 = inlined_call_operand.hbm [shape: f32[2,16,128], index: 0, kind: input, shape index: {}]   ;;  %s670_s1 = inlined_call_operand.vmem [shape: f32[2,128,16], index: 1, kind: output, shape index: {}]  }
   0x1   :  { %8 = vsyncpa [#allocation3 + $0x1], 0  ;;  %s511_s6 = smov 0   ;;  %s513_s7 = smov 0  }
   0x2   :  { %s515_s8 = smov 0   ;;  %s517_s9 = smov 0  }
   0x3   :  { %s519_s10 = smov 0   ;;  %s521_s11 = smov 0  }
   0x4 LB: > { %s343_s12 = sadd.s32 4294967295, %s496_s11   ;;  %s33_s13 = sadd.s32 1, %s492_s10  ;;  %s496_s11 = sphi %s521_s11, %s14_s11   ;;  %s492_s10 = sphi %s519_s10, %s678_s10   ;;  %s488_s9 = sphi %s517_s9, %s677_s9   ;;  %s484_s8 = sphi %s515_s8, %s676_s8   ;;  %s480_s7 = sphi %s513_s7, %s675_s7   ;;  %s476_s6 = sphi %s511_s6, %s674_s6  }
   0x5   : > { %p35_p0 = scmp.ge.s32.totalorder %s33_s13, 2  ;;  %s44_s14 = sadd.s32 1, %s484_s8 }
   0x6   : > { %p51_p1 = scmp.ne.s32.totalorder %s484_s8, %s480_s7  ;;  %p52_p2 = scmp.eq.s32.totalorder %s496_s11, 0 }
   0x7   : > { %s680_s13 = smov (%p35_p0, %s33_s13), 0  ;;  %p57_p4 = scmp.ne.s32.totalorder %s480_s7, %s476_s6 }
   0x8   : > { %p547_p3 = por %p52_p2, %p51_p1  ;;  %s37_s16 = ssub.s32 %s492_s10, %s680_s13 }
   0x9   : > { %p58_p5 = scmp.eq.s32.totalorder %s343_s12, 0  ;;  %p42_p6 = scmp.eq.s32.totalorder %s37_s16, 0 }
   0xa   : > { %p364_p8 = scmp.lt.s32.totalorder %s496_s11, 2  ;;  %s111_s19 = sand.u32 1, %s484_s8  }
   0xb   : > { %p554_p7 = por %p58_p5, %p57_p4  ;;  %s356_s20 = sshll.u32 %s492_s10, 8 }
   0xc   : > { %s560_s18 = scalar_select %p42_p6, %s484_s8, %s44_s14  }
   0xd   : > { %s347_s21 = sshll.u32 %s111_s19, 4  ;;  %s567_s24 = scalar_lea.hbm %s669_s0, %s356_s20 }
   0xe   : > { %s115_s25 = scalar_lea.vmem [#allocation2], %s347_s21  ;;  %p571_p9 = pnand %p364_p8, %p547_p3 }
   0xf   : > { %s125_s26 = sshll.u32 %s115_s25, 4  ;;  %s577_s28 = scalar_lea.sflag [#allocation3], %s111_s19  ;;  %s575_s26 = int_to_ptr.vmem [resolvable:$true] %s125_s26 }
  0x10   : > { %s416_s29 = scalar_lea.hbm %s567_s24, 256  ;;  %p418_p11 = pneg %p571_p9 }
  0x11   : > { %p417_p10 = scmp.ne.s32.totalorder %s567_s24, %s416_s29  ;;  %s421_s3 = scalar_lea.hbm %s669_s0, 512 }
  0x12   : > { %p422_p0 = scmp.lt.u32.totalorder %s567_s24, %s669_s0  ;;  %p423_p1 = scmp.lt.u32.totalorder %s421_s3, %s416_s29 }
  0x13   : > { %p419_p12 = pnand %p418_p11, %p417_p10  ;;  %p425_p3 = scmp.lt.u32.totalorder %s416_s29, %s567_s24 }
  0x14   : > { %p424_p2 = por %p423_p1, %p422_p0 }
  0x15   : > { %p420_p13 = pneg %p419_p12 }
  0x16   : > { %p426_p4 = por %p425_p3, %p424_p2 }
  0x18   : > { %p427_p5 = pnand %p426_p4, %p420_p13 }
  0x1a   : > { %430 = shalt.err (!%p427_p5)
}
  0x1b   : > { %s431_s6 = scalar_lea.vmem %s575_s26, 256  ;;  %s498_s12 = smov [#allocation2]  }
  0x1c   : > { %p432_p6 = scmp.ne.s32.totalorder %s575_s26, %s431_s6  ;;  %s436_s14 = sshll.u32 %s498_s12, 4  ;;  %s437_s14 = int_to_ptr.vmem [resolvable:$false] %s436_s14 }
  0x1d   : > { %s438_s15 = scalar_lea.vmem %s437_s14, 512  ;;  %p439_p12 = scmp.lt.s32.totalorder %s575_s26, %s437_s14 }
  0x1e   : > { %p434_p8 = pnand %p432_p6, %p418_p11  ;;  %p440_p0 = scmp.lt.s32.totalorder %s438_s15, %s431_s6 }
  0x20   : > { %p435_p10 = pneg %p434_p8  ;;  %p441_p1 = por %p440_p0, %p439_p12 }
  0x22   : > { %p442_p2 = pnand %p441_p1, %p435_p10 }
  0x24   : > { %445 = shalt.err (!%p442_p2)
}
  0x25   : > { %s499_s16 = smov 128   ;;  %s500_s19 = smov 8  }
  0x26   : > { %363 = dma.hbm_to_vmem [thread:$0]  (!%p571_p9), %s567_s24, 256, %s575_s26, %s577_s28, %s499_s16, %s499_s16, %s500_s19  }
  0x27   : > { %p350_p11 = scmp.ge.s32.totalorder %s496_s11, 1  ;;  %p133_p13 = scmp.lt.s32.totalorder %s496_s11, 3 }
  0x29   : > { %p134_p3 = pnand %p350_p11, %p133_p13 }
  0x2a   : > { %s139_s20 = sand.u32 (!%p134_p3), 1, %s480_s7  }
  0x2b   : > { %137 = sbr.rel (%p134_p3) target bundleno = 242 (0xf2), region = 24  ;;  %s351_s21 = sshll.u32 (!%p134_p3), %s139_s20, 4 }
  0x2c   : > { %s140_s22 = scalar_lea.sflag (!%p134_p3), [#allocation3], %s139_s20  ;;  %s143_s23 = scalar_lea.vmem (!%p134_p3), [#allocation2], %s351_s21 }
  0x32   : > { %471 = dma.done.wait (%p554_p7), %s140_s22, 256  }
  0x33   : > { %473 = vsyncadd (%p554_p7), %s140_s22, 4294967040  ;;  %v183_v0 = vld [vmem:[%s143_s23] sm:$0xff]  ;;  %v184_v1 = vld [vmem:[%s143_s23 + $0x8] sm:$0xff]  ;;  %p171_p9 = scmp.lt.s32.totalorder %s488_s9, 1  ;;  %vm217_vm0 = vcmask 130048  }
  0x34   : > { %185 = vxpose.xlu0.b32.start [1/2] (short) %v183_v0, 128 }
  0x35   : > { %s682_s9 = smov (!%p171_p9, %s488_s9), 1 }
  0x36   : > { %s357_s24 = sshll.u32 %s682_s9, 7 }
  0x37   : > { %s617_s27 = scalar_lea.vmem %s670_s1, %s357_s24 }
  0x38   : > { %186 = vxpose.xlu0.b32.end [2/2] (short) %v184_v1, 128 }
  0xb4   : > { %v201_v2 = vpop.trf.xlu0 }
  0xb5   : > { %218 = vst.msk [vmem:[%s617_s27] sm:$0xff] %vm217_vm0, %v201_v2 }
  0xb8   : > { %v202_v3 = vpop.trf.xlu0 }
  0xb9   : > { %219 = vst.msk [vmem:[%s617_s27 + $0x8] sm:$0xff] %vm217_vm0, %v202_v3 }
  0xbc   : > { %v203_v4 = vpop.trf.xlu0 }
  0xbd   : > { %220 = vst.msk [vmem:[%s617_s27 + $0x10] sm:$0xff] %vm217_vm0, %v203_v4 }
  0xc0   : > { %v204_v5 = vpop.trf.xlu0 }
  0xc1   : > { %221 = vst.msk [vmem:[%s617_s27 + $0x18] sm:$0xff] %vm217_vm0, %v204_v5 }
  0xc4   : > { %v205_v6 = vpop.trf.xlu0 }
  0xc5   : > { %222 = vst.msk [vmem:[%s617_s27 + $0x20] sm:$0xff] %vm217_vm0, %v205_v6 }
  0xc8   : > { %v206_v7 = vpop.trf.xlu0 }
  0xc9   : > { %223 = vst.msk [vmem:[%s617_s27 + $0x28] sm:$0xff] %vm217_vm0, %v206_v7 }
  0xcc   : > { %v207_v8 = vpop.trf.xlu0 }
  0xcd   : > { %224 = vst.msk [vmem:[%s617_s27 + $0x30] sm:$0xff] %vm217_vm0, %v207_v8 }
  0xd0   : > { %v208_v9 = vpop.trf.xlu0 }
  0xd1   : > { %225 = vst.msk [vmem:[%s617_s27 + $0x38] sm:$0xff] %vm217_vm0, %v208_v9 }
  0xd4   : > { %v209_v10 = vpop.trf.xlu0 }
  0xd5   : > { %226 = vst.msk [vmem:[%s617_s27 + $0x40] sm:$0xff] %vm217_vm0, %v209_v10 }
  0xd8   : > { %v210_v11 = vpop.trf.xlu0 }
  0xd9   : > { %227 = vst.msk [vmem:[%s617_s27 + $0x48] sm:$0xff] %vm217_vm0, %v210_v11 }
  0xdc   : > { %v211_v12 = vpop.trf.xlu0 }
  0xdd   : > { %228 = vst.msk [vmem:[%s617_s27 + $0x50] sm:$0xff] %vm217_vm0, %v211_v12 }
  0xe0   : > { %v212_v13 = vpop.trf.xlu0 }
  0xe1   : > { %229 = vst.msk [vmem:[%s617_s27 + $0x58] sm:$0xff] %vm217_vm0, %v212_v13 }
  0xe4   : > { %v213_v14 = vpop.trf.xlu0 }
  0xe5   : > { %230 = vst.msk [vmem:[%s617_s27 + $0x60] sm:$0xff] %vm217_vm0, %v213_v14 }
  0xe8   : > { %v214_v15 = vpop.trf.xlu0 }
  0xe9   : > { %231 = vst.msk [vmem:[%s617_s27 + $0x68] sm:$0xff] %vm217_vm0, %v214_v15 }
  0xec   : > { %v215_v16 = vpop.trf.xlu0 }
  0xed   : > { %232 = vst.msk [vmem:[%s617_s27 + $0x70] sm:$0xff] %vm217_vm0, %v215_v16 }
  0xf0   : > { %v216_v17 = vpop.trf.xlu0 }
  0xf1   : > { %233 = vst.msk [vmem:[%s617_s27 + $0x78] sm:$0xff] %vm217_vm0, %v216_v17 }
  0xf2 PF: > { %s14_s11 = sadd.s32 1, %s496_s11   ;;  %s674_s6 = smov %s480_s7 }
  0xf3   : > { %p11_p7 = scmp.ge.s32.totalorder %s14_s11, 4   ;;  %s675_s7 = smov %s484_s8 }
  0xf4   : > { %s676_s8 = smov %s560_s18  ;;  %s677_s9 = smov %s492_s10 }
  0xf5   : > { %s678_s10 = smov %s680_s13  ;;  %13 = sbr.rel (!%p11_p7) target bundleno = 4 (0x4), region = 64 }
  0xfc   :  { %270 = vsyncpa [#allocation3], 1 }
  0xfd   :  { %272 = vsyncpa [#allocation3 + $0x1], 1 }

</bundles_post_ra>
